<compile_context>
chip_gen: v7x
topology: tpu7x:2x2x1
jax: 0.10.0
libtpu: 0.0.40
codegen_flags: <defaults>
</compile_context>

<pallas_src>
import jax
import jax.numpy as jnp
from jax.experimental import pallas as pl
from jax.experimental.pallas import tpu as pltpu

_LANE = 128


def _sublane_granule(dtype) -> int:
    """Second-minor tile granule: 8 rows for 4-byte, 16 for 2-byte, 32 for 1-byte."""
    itemsize = jnp.dtype(dtype).itemsize
    if itemsize >= 4:
        return 8
    if itemsize == 2:
        return 16
    return 32


def _round_up(x: int, m: int) -> int:
    return ((x + m - 1) // m) * m


# ----------------------------------------------------------------------------
# Kernels
# ----------------------------------------------------------------------------
def _bias_add_kernel(x_ref, y_ref, o_ref):
    """out = x + y.  x_ref: (bt, tr, 128), y_ref: (1, tr, 128), o_ref: (bt, tr, 128)."""
    o_ref[...] = (x_ref[...] + y_ref[...]).astype(o_ref.dtype)


def _proj_kernel(w_ref, b_ref, y_ref):
    """y = W_proj @ bias_flat : (C_out, C_in) @ (C_in, t_hw) -> (C_out, t_hw)."""
    y_ref[...] = jnp.dot(
        w_ref[...], b_ref[...], preferred_element_type=jnp.float32
    ).astype(y_ref.dtype)


# ----------------------------------------------------------------------------
# Projection (one-shot, outside the batch loop)
# ----------------------------------------------------------------------------
def _project_bias(bias_flat, proj_weight):
    """(C_out, C_in) @ (C_in, HW) -> (C_out, HW)."""
    C_out, C_in = proj_weight.shape
    HW = bias_flat.shape[1]
    # Tiny channel counts (the common GlobalBias case) would pad the MXU to
    # <1% utilization; do the one-shot projection in plain JAX instead and
    # keep the Pallas matmul only for genuinely large channel dims.
    if not (C_in >= 128 and C_out >= 128 and HW % _LANE == 0):
        return jnp.dot(proj_weight, bias_flat)

    t_hw = min(HW, 2048)  # multiple of 128 (HW % 128 == 0 in this branch)
    return pl.pallas_call(
        _proj_kernel,
        out_shape=jax.ShapeDtypeStruct((C_out, HW), bias_flat.dtype),
        grid=(pl.cdiv(HW, t_hw),),
        in_specs=[
            pl.BlockSpec((C_out, C_in), lambda j: (0, 0)),
            pl.BlockSpec((C_in, t_hw), lambda j: (0, j)),
        ],
        out_specs=pl.BlockSpec((C_out, t_hw), lambda j: (0, j)),
        compiler_params=pltpu.CompilerParams(dimension_semantics=("parallel",)),
    )(proj_weight, bias_flat)


# ----------------------------------------------------------------------------
# Wrapper
# ----------------------------------------------------------------------------
def global_bias_forward(x, bias, proj_weight=None, *,
                        block_bytes=4 * 1024 * 1024, donate_x=False):
    """Pallas implementation of GlobalBias.forward.

    x:           (B, output_dim, H, W)   NCHW
    bias:        (input_dim, H, W)
    proj_weight: (output_dim, input_dim) or None (when input_dim == output_dim)
    block_bytes: target per-block byte budget for the streaming add
                 (4 MiB is a good default on v6e/v7x; also fine on v5e because
                 vmem_limit_bytes is set explicitly from the working set).
    donate_x:    if the caller can donate x, alias it with the output.
    """
    B, C_out, H, W = x.shape
    C_in, Hb, Wb = bias.shape
    assert (Hb, Wb) == (H, W)
    HW = H * W
    F = C_out * HW

    bias_flat = bias.reshape(C_in, HW)

    # ---- projected bias: computed ONCE, outside the batch loop ------------
    if proj_weight is None:
        assert C_in == C_out
        y_flat = bias_flat.reshape(1, F)
    else:
        assert proj_weight.shape == (C_out, C_in)
        y_flat = _project_bias(bias_flat, proj_weight).reshape(1, F)

    # Match jnp/PyTorch promotion semantics (x + y), then pre-cast y once so
    # the resident bias block needs no per-step cast inside the kernel.
    out_dtype = jnp.result_type(x.dtype, y_flat.dtype)
    y_flat = y_flat.astype(out_dtype)

    # ---- lane-dense layout: pad features to a multiple of 128 lanes -------
    Fp = _round_up(F, _LANE)
    x2 = x.reshape(B, F)
    if Fp != F:
        x2 = jnp.pad(x2, ((0, 0), (0, Fp - F)))
        y_flat = jnp.pad(y_flat, ((0, 0), (0, Fp - F)))
    R = Fp // _LANE
    x3 = x2.reshape(B, R, _LANE)
    y3 = y_flat.reshape(1, R, _LANE)

    # ---- cdiv-based tiling (ragged last blocks are masked by Pallas) ------
    itemsize = max(jnp.dtype(x.dtype).itemsize, jnp.dtype(out_dtype).itemsize)
    g = _sublane_granule(out_dtype)
    bytes_per_row = _LANE * itemsize
    row_budget = max(g, (block_bytes // bytes_per_row) // g * g)
    # tr is either the full row extent (always a legal block dim) or a
    # multiple of the dtype's sublane granule.
    tr = R if R <= row_budget else row_budget
    bt = max(1, min(B, block_bytes // (tr * bytes_per_row)))
    grid_r = pl.cdiv(R, tr)
    grid_b = pl.cdiv(B, bt)

    # Rows OUTER, batch INNER: y's block index (0, r, 0) is constant along the
    # inner batch loop, so Pallas fetches each bias block exactly once.
    grid = (grid_r, grid_b)
    if grid_r > 1:
        dim_sem = ("parallel", "arbitrary")   # megacore shards rows on v7x
    else:
        dim_sem = ("arbitrary", "parallel")   # single bias block: shard batch

    # VMEM budget = double-buffered x block + out block + resident y block.
    x_blk = bt * tr * _LANE * jnp.dtype(x.dtype).itemsize
    o_blk = bt * tr * _LANE * jnp.dtype(out_dtype).itemsize
    y_blk = tr * _LANE * jnp.dtype(out_dtype).itemsize
    vmem_limit = min(2 * (x_blk + o_blk + y_blk) + (4 << 20), 56 << 20)

    aliases = {0: 0} if (donate_x and x.dtype == out_dtype) else {}

    out3 = pl.pallas_call(
        _bias_add_kernel,
        out_shape=jax.ShapeDtypeStruct((B, R, _LANE), out_dtype),
        grid=grid,
        in_specs=[
            pl.BlockSpec((bt, tr, _LANE), lambda r, b: (b, r, 0)),
            pl.BlockSpec((1, tr, _LANE), lambda r, b: (0, r, 0)),
        ],
        out_specs=pl.BlockSpec((bt, tr, _LANE), lambda r, b: (b, r, 0)),
        compiler_params=pltpu.CompilerParams(
            dimension_semantics=dim_sem,
            vmem_limit_bytes=int(vmem_limit),
        ),
        input_output_aliases=aliases,
    )(x3, y3)

    out_flat = out3.reshape(B, Fp)
    if Fp != F:
        out_flat = out_flat[:, :F]
    return out_flat.reshape(B, C_out, H, W)


# ----------------------------------------------------------------------------
# Reference (pure JAX) for correctness checking
# ----------------------------------------------------------------------------
def global_bias_ref(x, bias, proj_weight=None):
    if proj_weight is None:
        y = bias
    else:
        y = jnp.einsum("iab,ji->jab", bias, proj_weight)
    return x + y[None]


if __name__ == "__main__":
    key = jax.random.PRNGKey(0)
    k_x, k_b, k_w, k_x2, k_b2, k_x3, k_b3, k_w3 = jax.random.split(key, 8)

    # --- projection path: input_dim != output_dim, 128-aligned features ----
    B, input_dim, output_dim, H, W = 2, 4, 8, 16, 16
    x = jax.random.normal(k_x, (B, output_dim, H, W), dtype=jnp.float32)
    # NOTE: the real module inits bias to zeros; randomize so the compute path
    # is actually exercised.
    bias = jax.random.normal(k_b, (input_dim, H, W), dtype=jnp.float32) * 0.1
    proj_w = jax.random.normal(k_w, (output_dim, input_dim), dtype=jnp.float32) * 0.5

    out = jax.block_until_ready(global_bias_forward(x, bias, proj_w))
    ref = global_bias_ref(x, bias, proj_w)
    assert out.shape == (B, output_dim, H, W)
    assert out.dtype == ref.dtype
    assert jnp.allclose(out, ref, atol=1e-5, rtol=1e-5)

    # --- identity path: input_dim == output_dim -----------------------------
    C = 8
    x2 = jax.random.normal(k_x2, (B, C, H, W), dtype=jnp.float32)
    bias2 = jax.random.normal(k_b2, (C, H, W), dtype=jnp.float32) * 0.1
    out2 = jax.block_until_ready(global_bias_forward(x2, bias2, None))
    ref2 = global_bias_ref(x2, bias2, None)
    assert jnp.allclose(out2, ref2, atol=1e-5, rtol=1e-5)

    # --- unaligned features (C*H*W % 128 != 0): exercises the lane padding --
    Bi, Ci, Co, Hi, Wi = 2, 3, 6, 7, 5
    x3 = jax.random.normal(k_x3, (Bi, Co, Hi, Wi), dtype=jnp.float32)
    bias3 = jax.random.normal(k_b3, (Ci, Hi, Wi), dtype=jnp.float32) * 0.1
    proj_w3 = jax.random.normal(k_w3, (Co, Ci), dtype=jnp.float32) * 0.5
    out3 = jax.block_until_ready(global_bias_forward(x3, bias3, proj_w3))
    ref3 = global_bias_ref(x3, bias3, proj_w3)
    assert jnp.allclose(out3, ref3, atol=1e-5, rtol=1e-5)

    print("KERNEL_OK")
</pallas_src>

<mosaic_0001>
module attributes {stable_mosaic.version = 11 : i64} {
  func.func @_bias_add_kernel(%arg0: i32, %arg1: i32, %arg2: memref<2x16x128xf32, #tpu.memory_space<vmem>>, %arg3: memref<1x16x128xf32, #tpu.memory_space<vmem>>, %arg4: memref<2x16x128xf32, #tpu.memory_space<vmem>>) attributes {dimension_semantics = [#tpu.dimension_semantics<arbitrary>, #tpu.dimension_semantics<parallel>], iteration_bounds = array<i64: 1, 1>, scalar_prefetch = 0 : i64, scratch_operands = 0 : i64, tpu.core_type = #tpu.core_type<tc>, window_params = [{transform_indices = @transform_0, window_bounds = array<i64: 2, 16, 128>}, {transform_indices = @transform_1, window_bounds = array<i64: 1, 16, 128>}, {transform_indices = @transform_2, window_bounds = array<i64: 2, 16, 128>}]} {
    %c0 = arith.constant 0 : index
    %c0_0 = arith.constant 0 : index
    %c0_1 = arith.constant 0 : index
    %0 = vector.load %arg2[%c0, %c0_0, %c0_1] : memref<2x16x128xf32, #tpu.memory_space<vmem>>, vector<2x16x128xf32>
    %c0_2 = arith.constant 0 : index
    %c0_3 = arith.constant 0 : index
    %c0_4 = arith.constant 0 : index
    %1 = vector.load %arg3[%c0_2, %c0_3, %c0_4] : memref<1x16x128xf32, #tpu.memory_space<vmem>>, vector<1x16x128xf32>
    %2 = vector.broadcast %1 : vector<1x16x128xf32> to vector<2x16x128xf32>
    %3 = arith.addf %0, %2 : vector<2x16x128xf32>
    %c0_5 = arith.constant 0 : index
    %c0_6 = arith.constant 0 : index
    %c0_7 = arith.constant 0 : index
    %4 = vector.load %arg4[%c0_5, %c0_6, %c0_7] : memref<2x16x128xf32, #tpu.memory_space<vmem>>, vector<2x16x128xf32>
    tpu.vector_store %arg4[%c0_5, %c0_6, %c0_7], %3 {strides = array<i32>} : memref<2x16x128xf32, #tpu.memory_space<vmem>>, vector<2x16x128xf32>,
    return
  }
  func.func @transform_0(%arg0: i32, %arg1: i32) -> (i32, i32, i32) {
    %c0_i32 = arith.constant 0 : i32
    %c0_i32_0 = arith.constant 0 : i32
    return %arg1, %arg0, %c0_i32 : i32, i32, i32
  }
  func.func @transform_1(%arg0: i32, %arg1: i32) -> (i32, i32, i32) {
    %c0_i32 = arith.constant 0 : i32
    %c0_i32_0 = arith.constant 0 : i32
    %c0_i32_1 = arith.constant 0 : i32
    return %c0_i32, %arg0, %c0_i32_0 : i32, i32, i32
  }
  func.func @transform_2(%arg0: i32, %arg1: i32) -> (i32, i32, i32) {
    %c0_i32 = arith.constant 0 : i32
    %c0_i32_0 = arith.constant 0 : i32
    return %arg1, %arg0, %c0_i32 : i32, i32, i32
  }
}

</mosaic_0001>

<bundles_post_ra>
// kernel: tpu_custom_call.1
= control target key start
LH: loop header
LB: loop body
LE: loop exit
PB: predicated region body
PF: predicated region fallthrough
CT: control target
= control target key end

     0   :  { %7 = vsyncpa [#allocation3], 0  ;;  %s214_s0 = inlined_call_operand.hbm [shape: f32[2,16,128], index: 0, kind: input, shape index: {}]   ;;  %s215_s1 = inlined_call_operand.hbm [shape: f32[1,16,128], index: 1, kind: input, shape index: {}]   ;;  %s216_s2 = inlined_call_operand.hbm [shape: f32[2,16,128], index: 2, kind: output, shape index: {}]  }
   0x1   :  { %8 = vsyncpa [#allocation6], 0 }
   0x2   :  { %9 = vsyncpa [#allocation4], 0  ;;  %s149_s9 = smov [#allocation2]   ;;  %s77_s13 = scalar_lea.hbm %s214_s0, 512 }
   0x3   :  { %s15_s10 = sshll.u32 %s149_s9, 4  ;;  %p78_p0 = scmp.ne.s32.totalorder %s214_s0, %s77_s13  ;;  %s16_s10 = int_to_ptr.vmem [resolvable:$true] %s15_s10 }
   0x4   :  { %p81_p1 = scmp.lt.u32.totalorder %s77_s13, %s214_s0 }
   0x6   :  { %p83_p2 = pnand %p81_p1, %p78_p0 }
   0x8   :  { %86 = shalt.err (!%p83_p2)
}
   0x9   :  { %s87_s18 = scalar_lea.vmem %s16_s10, 512  ;;  %p92_p4 = scmp.lt.s32.totalorder %s16_s10, %s16_s10 }
   0xa   :  { %p88_p3 = scmp.ne.s32.totalorder %s16_s10, %s87_s18  ;;  %p93_p5 = scmp.lt.s32.totalorder %s87_s18, %s87_s18 }
   0xc   :  { %p94_p6 = por %p93_p5, %p92_p4 }
   0xe   :  { %p95_p7 = pnand %p94_p6, %p88_p3 }
  0x10   :  { %98 = shalt.err (!%p95_p7)
}
  0x11   :  { %s150_s19 = smov 128   ;;  %s151_s20 = smov 8  }
  0x12   :  { %21 = dma.hbm_to_vmem [thread:$0]  %s214_s0, 512, %s16_s10, [#allocation3], %s150_s19, %s150_s19, %s151_s20  }
  0x13   :  { %s152_s23 = smov [#allocation5]   ;;  %s99_s27 = scalar_lea.hbm %s215_s1, 256 }
  0x14   :  { %s27_s24 = sshll.u32 %s152_s23, 4  ;;  %p100_p8 = scmp.ne.s32.totalorder %s215_s1, %s99_s27  ;;  %s28_s24 = int_to_ptr.vmem [resolvable:$true] %s27_s24 }
  0x15   :  { %p103_p9 = scmp.lt.u32.totalorder %s99_s27, %s215_s1 }
  0x17   :  { %p105_p10 = pnand %p103_p9, %p100_p8 }
  0x19   :  { %108 = shalt.err (!%p105_p10)
}
  0x1a   :  { %s109_s4 = scalar_lea.vmem %s28_s24, 256  ;;  %p114_p12 = scmp.lt.s32.totalorder %s28_s24, %s28_s24 }
  0x1b   :  { %p110_p11 = scmp.ne.s32.totalorder %s28_s24, %s109_s4  ;;  %p115_p13 = scmp.lt.s32.totalorder %s109_s4, %s109_s4 }
  0x1d   :  { %p116_p0 = por %p115_p13, %p114_p12 }
  0x1f   :  { %p117_p1 = pnand %p116_p0, %p110_p11 }
  0x21   :  { %120 = shalt.err (!%p117_p1)
}
  0x22   :  { %33 = dma.hbm_to_vmem [thread:$0]  %s215_s1, 256, %s28_s24, [#allocation6], %s150_s19, %s150_s19, %s151_s20  }
  0x23   :  { %143 = dma.done.wait [#allocation3], 512  }
  0x24   :  { %144 = vsyncadd [#allocation3], 4294966784 }
  0x25   :  { %145 = dma.done.wait [#allocation6], 256  }
  0x26   :  { %146 = vsyncadd [#allocation6], 4294967040  ;;  %s153_s6 = smov [#allocation7]   ;;  %v40_v0 = vld [vmem:[#allocation2] sm:$0xff]  ;;  %v41_v2 = vld [vmem:[#allocation2 + $0x8] sm:$0xff] }
  0x27   :  { %s59_s7 = sshll.u32 %s153_s6, 4  ;;  %v44_v1 = vld [vmem:[#allocation5] sm:$0xff]  ;;  %v45_v4 = vld [vmem:[#allocation5 + $0x8] sm:$0xff]  ;;  %v42_v5 = vld [vmem:[#allocation2 + $0x10] sm:$0xff]  ;;  %s60_s7 = int_to_ptr.vmem [resolvable:$true] %s59_s7 }
  0x28   :  { %v46_v3 = vadd.f32 %v44_v1, %v40_v0  ;;  %v43_v6 = vld [vmem:[#allocation2 + $0x18] sm:$0xff]  ;;  %v47_v7 = vadd.f32 %v45_v4, %v41_v2  ;;  %v48_v8 = vadd.f32 %v44_v1, %v42_v5  ;;  %s121_s1 = scalar_lea.vmem %s60_s7, 512  ;;  %p126_p3 = scmp.lt.s32.totalorder %s60_s7, %s60_s7 }
  0x29   :  { %v49_v9 = vadd.f32 %v45_v4, %v43_v6  ;;  %p122_p2 = scmp.ne.s32.totalorder %s60_s7, %s121_s1  ;;  %p127_p4 = scmp.lt.s32.totalorder %s121_s1, %s121_s1 }
  0x2a   :  { %50 = vst [vmem:[#allocation7] sm:$0xff] %v46_v3  ;;  %51 = vst [vmem:[#allocation7 + $0x8] sm:$0xff] %v47_v7 }
  0x2b   :  { %52 = vst [vmem:[#allocation7 + $0x10] sm:$0xff] %v48_v8  ;;  %53 = vst [vmem:[#allocation7 + $0x18] sm:$0xff] %v49_v9  ;;  %p128_p5 = por %p127_p4, %p126_p3 }
  0x2d   :  { %p129_p6 = pnand %p128_p5, %p122_p2 }
  0x2f   :  { %132 = shalt.err (!%p129_p6)
}
  0x30   :  { %s133_s10 = scalar_lea.hbm %s216_s2, 512 }
  0x31   :  { %p134_p7 = scmp.ne.s32.totalorder %s216_s2, %s133_s10  ;;  %p137_p8 = scmp.lt.u32.totalorder %s133_s10, %s216_s2 }
  0x33   :  { %p139_p9 = pnand %p137_p8, %p134_p7 }
  0x35   :  { %142 = shalt.err (!%p139_p9)
}
  0x36   :  { %65 = dma.vmem_to_hbm [thread:$0]  %s60_s7, 512, %s216_s2, [#allocation4], %s150_s19, %s150_s19, %s151_s20  }
  0x37   :  { %147 = dma.done.wait [#allocation4], 512  }
  0x38   :  { %148 = vsyncadd [#allocation4], 4294966784 }
  0x39   :  { %69 = vsyncpa [#allocation3], 1 }
  0x3a   :  { %70 = vsyncpa [#allocation6], 1 }
  0x3b   :  { %71 = vsyncpa [#allocation4], 1 }

</bundles_post_ra>
